<compile_context>
chip_gen: v6e
topology: v6e:2x2x1
jax: 0.10.0
libtpu: 0.0.40
codegen_flags: <defaults>
</compile_context>

<pallas_src>
import math
from functools import partial

import jax
import jax.numpy as jnp
from jax.experimental import pallas as pl
from jax.experimental.pallas import tpu as pltpu

LANE = 128


def _round_up(x, m):
    return ((x + m - 1) // m) * m


def convmodel_kernel(x_ref, w1_ref, b1_ref, w2_ref, b2_ref, o_ref):
    # x_ref : (tile_n, K_pad) bf16    w1_ref: (K_pad, C_mid) bf16
    # b1_ref: (1, C_mid)      f32     w2_ref: (C_mid, C_out) bf16
    # b2_ref: (1, C_out)      f32     o_ref : (tile_n, C_out) f32
    h = jnp.dot(x_ref[...], w1_ref[...], preferred_element_type=jnp.float32)
    h = jnp.maximum(h + b1_ref[...], 0.0)                     # Conv bias + ReLU (f32)
    y = jnp.dot(h.astype(jnp.bfloat16), w2_ref[...],
                preferred_element_type=jnp.float32)
    o_ref[...] = jnp.maximum(y + b2_ref[...], 0.0).astype(o_ref.dtype)  # Linear + ReLU


def prepare_params(conv_w, conv_b, lin_w, lin_b):
    """One-time weight prep (reshape / transpose / pad / cast) outside the hot path."""
    c_mid = conv_w.shape[0]
    in_shape = tuple(conv_w.shape[1:])                        # (C_in, 7, 7, 7)
    k_raw = math.prod(in_shape)
    k_pad = _round_up(k_raw, LANE)

    w1 = jnp.asarray(conv_w, jnp.float32).reshape(c_mid, k_raw).T        # (K, C_mid)
    w1 = jnp.pad(w1, ((0, k_pad - k_raw), (0, 0))).astype(jnp.bfloat16)  # (K_pad, C_mid)
    b1 = jnp.asarray(conv_b, jnp.float32).reshape(1, c_mid)
    w2 = jnp.asarray(lin_w, jnp.float32).T.astype(jnp.bfloat16)          # (C_mid, C_out)
    b2 = jnp.asarray(lin_b, jnp.float32).reshape(1, -1)
    return {"w1": w1, "b1": b1, "w2": w2, "b2": b2, "in_shape": in_shape}


@partial(jax.jit, static_argnames=("in_shape", "tile_n"))
def conv_model_forward(x_ncdhw, w1, b1, w2, b2, *, in_shape, tile_n=1024):
    # Conv3d(kernel=7) on a 7x7x7 volume is the only case where Flatten yields
    # exactly C_mid features for Linear(256, 64); fail loudly otherwise.
    assert tuple(x_ncdhw.shape[1:]) == tuple(in_shape), (
        f"ConvModel requires input spatial dims equal to the Conv3d kernel "
        f"{in_shape}, got {tuple(x_ncdhw.shape[1:])}")

    n = x_ncdhw.shape[0]
    k_raw = math.prod(in_shape)
    k_pad, c_mid = w1.shape
    c_out = w2.shape[1]

    # Row-tile the batch; cap the tile so tiny batches don't over-pad.
    tile_n = min(tile_n, _round_up(n, 8))
    n_pad = _round_up(n, tile_n)

    # Flatten, cast to bf16 and zero-pad (K -> lane multiple, N -> tile multiple).
    x_flat = x_ncdhw.reshape(n, k_raw).astype(jnp.bfloat16)
    x_flat = jnp.pad(x_flat, ((0, n_pad - n), (0, k_pad - k_raw)))

    grid = (n_pad // tile_n,)
    flops = 2 * n_pad * (k_pad * c_mid + c_mid * c_out)
    bytes_accessed = (n_pad * k_pad * 2          # x (bf16)
                      + k_pad * c_mid * 2        # w1 (bf16)
                      + c_mid * c_out * 2        # w2 (bf16)
                      + (c_mid + c_out) * 4      # biases (f32)
                      + n_pad * c_out * 4)       # output (f32)

    out = pl.pallas_call(
        convmodel_kernel,
        out_shape=jax.ShapeDtypeStruct((n_pad, c_out), jnp.float32),
        grid=grid,
        in_specs=[
            pl.BlockSpec((tile_n, k_pad), lambda i: (i, 0)),   # x: streamed tile
            pl.BlockSpec((k_pad, c_mid), lambda i: (0, 0)),    # w1: resident
            pl.BlockSpec((1, c_mid), lambda i: (0, 0)),        # b1: resident
            pl.BlockSpec((c_mid, c_out), lambda i: (0, 0)),    # w2: resident
            pl.BlockSpec((1, c_out), lambda i: (0, 0)),        # b2: resident
        ],
        out_specs=pl.BlockSpec((tile_n, c_out), lambda i: (i, 0)),
        compiler_params=pltpu.CompilerParams(
            dimension_semantics=("parallel",),        # shard batch tiles across TCs (v7x)
            vmem_limit_bytes=32 * 1024 * 1024,        # fits v5e/v6e/v7x budgets
        ),
        cost_estimate=pl.CostEstimate(flops=flops, transcendentals=0,
                                      bytes_accessed=bytes_accessed),
    )(x_flat, w1, b1, w2, b2)

    return out[:n] if n_pad != n else out


if __name__ == "__main__":
    key = jax.random.PRNGKey(0)
    k_x, k_cw, k_cb, k_lw, k_lb = jax.random.split(key, 5)

    N, C_IN, K3 = 4, 1, 7            # spatial must equal the conv kernel size
    C_MID, C_OUT = 256, 64
    x = jax.random.normal(k_x, (N, C_IN, K3, K3, K3), dtype=jnp.float32)

    # Deterministic PyTorch-style uniform fan-in init.
    fan1 = C_IN * K3 * K3 * K3
    bound1 = 1.0 / math.sqrt(fan1)
    conv_w = jax.random.uniform(k_cw, (C_MID, C_IN, K3, K3, K3),
                                minval=-bound1, maxval=bound1, dtype=jnp.float32)
    conv_b = jax.random.uniform(k_cb, (C_MID,),
                                minval=-bound1, maxval=bound1, dtype=jnp.float32)
    bound2 = 1.0 / math.sqrt(C_MID)
    lin_w = jax.random.uniform(k_lw, (C_OUT, C_MID),
                               minval=-bound2, maxval=bound2, dtype=jnp.float32)
    lin_b = jax.random.uniform(k_lb, (C_OUT,),
                               minval=-bound2, maxval=bound2, dtype=jnp.float32)

    params = prepare_params(conv_w, conv_b, lin_w, lin_b)
    out = conv_model_forward(x, params["w1"], params["b1"], params["w2"],
                             params["b2"], in_shape=params["in_shape"])
    jax.block_until_ready(out)

    # Pure-JAX reference mirroring the kernel numerics (bf16 inputs, f32 accum).
    def _q(a):  # bf16 quantize, compute in f32
        return a.astype(jnp.bfloat16).astype(jnp.float32)

    x_flat = x.reshape(N, -1)
    w1_ref = conv_w.reshape(C_MID, -1).T
    h_ref = jnp.maximum(_q(x_flat) @ _q(w1_ref) + conv_b, 0.0)
    y_ref = jnp.maximum(_q(h_ref) @ _q(lin_w.T) + lin_b, 0.0)

    assert out.shape == (N, C_OUT)
    assert jnp.allclose(out, y_ref, atol=2e-3, rtol=2e-3), \
        float(jnp.max(jnp.abs(out - y_ref)))

    print("KERNEL_OK")
</pallas_src>

<mosaic_0001>
module attributes {stable_mosaic.version = 11 : i64} {
  func.func @convmodel_kernel(%arg0: i32, %arg1: memref<8x384xbf16, #tpu.memory_space<vmem>>, %arg2: memref<384x256xbf16, #tpu.memory_space<vmem>>, %arg3: memref<1x256xf32, #tpu.memory_space<vmem>>, %arg4: memref<256x64xbf16, #tpu.memory_space<vmem>>, %arg5: memref<1x64xf32, #tpu.memory_space<vmem>>, %arg6: memref<8x64xf32, #tpu.memory_space<vmem>>) attributes {dimension_semantics = [#tpu.dimension_semantics<parallel>], iteration_bounds = array<i64: 1>, scalar_prefetch = 0 : i64, scratch_operands = 0 : i64, tpu.core_type = #tpu.core_type<tc>, window_params = [{transform_indices = @transform_0, window_bounds = array<i64: 8, 384>}, {pipeline_mode = #tpu.pipeline_mode<synchronous>, transform_indices = @transform_1, window_bounds = array<i64: 384, 256>}, {pipeline_mode = #tpu.pipeline_mode<synchronous>, transform_indices = @transform_2, window_bounds = array<i64: 1, 256>}, {pipeline_mode = #tpu.pipeline_mode<synchronous>, transform_indices = @transform_3, window_bounds = array<i64: 256, 64>}, {pipeline_mode = #tpu.pipeline_mode<synchronous>, transform_indices = @transform_4, window_bounds = array<i64: 1, 64>}, {transform_indices = @transform_5, window_bounds = array<i64: 8, 64>}]} {
    %c0 = arith.constant 0 : index
    %c0_0 = arith.constant 0 : index
    %0 = vector.load %arg1[%c0, %c0_0] : memref<8x384xbf16, #tpu.memory_space<vmem>>, vector<8x384xbf16>
    %c0_1 = arith.constant 0 : index
    %c0_2 = arith.constant 0 : index
    %1 = vector.load %arg2[%c0_1, %c0_2] : memref<384x256xbf16, #tpu.memory_space<vmem>>, vector<384x256xbf16>
    %cst = arith.constant dense<0.000000e+00> : vector<8x256xf32>
    %2 = tpu.matmul %0, %1, %cst {dimension_numbers = #tpu.dot_dimension_numbers<[1], [0], [0], [1], [0, 0, 1, 1], [], []>} : vector<8x384xbf16>, vector<384x256xbf16>, vector<8x256xf32> -> vector<8x256xf32>
    %c0_3 = arith.constant 0 : index
    %c0_4 = arith.constant 0 : index
    %3 = vector.load %arg3[%c0_3, %c0_4] : memref<1x256xf32, #tpu.memory_space<vmem>>, vector<1x256xf32>
    %4 = vector.broadcast %3 : vector<1x256xf32> to vector<8x256xf32>
    %5 = arith.addf %2, %4 : vector<8x256xf32>
    %cst_5 = arith.constant 0.000000e+00 : f32
    %6 = vector.broadcast %cst_5 : f32 to vector<8x256xf32>
    %7 = arith.maximumf %5, %6 : vector<8x256xf32>
    %8 = arith.truncf %7 : vector<8x256xf32> to vector<8x256xbf16>
    %c0_6 = arith.constant 0 : index
    %c0_7 = arith.constant 0 : index
    %9 = vector.load %arg4[%c0_6, %c0_7] : memref<256x64xbf16, #tpu.memory_space<vmem>>, vector<256x64xbf16>
    %cst_8 = arith.constant dense<0.000000e+00> : vector<8x64xf32>
    %10 = tpu.matmul %8, %9, %cst_8 {dimension_numbers = #tpu.dot_dimension_numbers<[1], [0], [0], [1], [0, 0, 1, 1], [], []>} : vector<8x256xbf16>, vector<256x64xbf16>, vector<8x64xf32> -> vector<8x64xf32>
    %c0_9 = arith.constant 0 : index
    %c0_10 = arith.constant 0 : index
    %11 = vector.load %arg5[%c0_9, %c0_10] : memref<1x64xf32, #tpu.memory_space<vmem>>, vector<1x64xf32>
    %12 = vector.broadcast %11 : vector<1x64xf32> to vector<8x64xf32>
    %13 = arith.addf %10, %12 : vector<8x64xf32>
    %cst_11 = arith.constant 0.000000e+00 : f32
    %14 = vector.broadcast %cst_11 : f32 to vector<8x64xf32>
    %15 = arith.maximumf %13, %14 : vector<8x64xf32>
    %c0_12 = arith.constant 0 : index
    %c0_13 = arith.constant 0 : index
    %16 = vector.load %arg6[%c0_12, %c0_13] : memref<8x64xf32, #tpu.memory_space<vmem>>, vector<8x64xf32>
    tpu.vector_store %arg6[%c0_12, %c0_13], %15 {strides = array<i32>} : memref<8x64xf32, #tpu.memory_space<vmem>>, vector<8x64xf32>,
    return
  }
  func.func @transform_0(%arg0: i32) -> (i32, i32) {
    %c0_i32 = arith.constant 0 : i32
    %c0_i32_0 = arith.constant 0 : i32
    return %arg0, %c0_i32 : i32, i32
  }
  func.func @transform_1(%arg0: i32) -> (i32, i32) {
    %c0_i32 = arith.constant 0 : i32
    %c0_i32_0 = arith.constant 0 : i32
    %c0_i32_1 = arith.constant 0 : i32
    return %c0_i32, %c0_i32_0 : i32, i32
  }
  func.func @transform_2(%arg0: i32) -> (i32, i32) {
    %c0_i32 = arith.constant 0 : i32
    %c0_i32_0 = arith.constant 0 : i32
    %c0_i32_1 = arith.constant 0 : i32
    return %c0_i32, %c0_i32_0 : i32, i32
  }
  func.func @transform_3(%arg0: i32) -> (i32, i32) {
    %c0_i32 = arith.constant 0 : i32
    %c0_i32_0 = arith.constant 0 : i32
    %c0_i32_1 = arith.constant 0 : i32
    return %c0_i32, %c0_i32_0 : i32, i32
  }
  func.func @transform_4(%arg0: i32) -> (i32, i32) {
    %c0_i32 = arith.constant 0 : i32
    %c0_i32_0 = arith.constant 0 : i32
    %c0_i32_1 = arith.constant 0 : i32
    return %c0_i32, %c0_i32_0 : i32, i32
  }
  func.func @transform_5(%arg0: i32) -> (i32, i32) {
    %c0_i32 = arith.constant 0 : i32
    %c0_i32_0 = arith.constant 0 : i32
    return %arg0, %c0_i32 : i32, i32
  }
}

</mosaic_0001>

<bundles_post_ra>
// kernel: conv_model_forward.1
= control target key start
LH: loop header
LB: loop body
LE: loop exit
PB: predicated region body
PF: predicated region fallthrough
CT: control target
= control target key end

     0   :  { %v784_v1 = vmov 0   ;;  %vm596_vm0 = vcmask 523264   ;;  %s1022_s1 = inlined_call_operand.vmem [shape: bf16[384,256], index: 1, kind: input, shape index: {}]   ;;  %s1023_s0 = inlined_call_operand.vmem [shape: bf16[8,384], index: 0, kind: input, shape index: {}]   ;;  %s1024_s3 = inlined_call_operand.vmem [shape: bf16[256,64], index: 3, kind: input, shape index: {}]   ;;  %s1025_s2 = inlined_call_operand.vmem [shape: f32[1,256], index: 2, kind: input, shape index: {}]   ;;  %s1026_s4 = inlined_call_operand.vmem [shape: f32[1,64], index: 4, kind: input, shape index: {}]   ;;  %s1027_s5 = inlined_call_operand.vmem [shape: f32[8,64], index: 5, kind: output, shape index: {}]  }
   0x1   :  { %v693_v0 = vld [vmem:[%s1022_s1 + $0x74] ss:$8 sps:$4 sm:$0xff]   ;;  %407 = vmatprep.mubr.bf16.mxu1 %v784_v1  ;;  %v695_v2 = vld [vmem:[%s1022_s1 + $0x70] ss:$8 sps:$4 sm:$0xff]   ;;  %v696_v3 = vld [vmem:[%s1022_s1 + $0x64] ss:$8 sps:$4 sm:$0xff]  }
   0x2   :  { %334 = vmatprep.subr.bf16.mxu0 %v693_v0  ;;  %v698_v4 = vld [vmem:[%s1022_s1 + $0x60] ss:$8 sps:$4 sm:$0xff]   ;;  %v699_v5 = vld [vmem:[%s1022_s1 + $0x54] ss:$8 sps:$4 sm:$0xff]   ;;  %v701_v6 = vld [vmem:[%s1022_s1 + $0x50] ss:$8 sps:$4 sm:$0xff]  }
   0x3   :  { %335 = vmatpush1.bf16.msra.mxu0 %v695_v2  ;;  %v702_v7 = vld [vmem:[%s1022_s1 + $0x44] ss:$8 sps:$4 sm:$0xff]   ;;  %v704_v8 = vld [vmem:[%s1022_s1 + $0x40] ss:$8 sps:$4 sm:$0xff]   ;;  %v716_v9 = vld [vmem:[%s1022_s1 + $0x174] ss:$8 sps:$4 sm:$0xff]  }
   0x4   :  { %336 = vmatprep.subr.bf16.mxu0 %v696_v3  ;;  %v719_v10 = vld [vmem:[%s1022_s1 + $0x170] ss:$8 sps:$4 sm:$0xff]   ;;  %v705_v11 = vld [vmem:[%s1022_s1 + $0x34] ss:$8 sps:$4 sm:$0xff]   ;;  %375 = vmatprep.subr.bf16.mxu1 %v716_v9  ;;  %v722_v12 = vld [vmem:[%s1022_s1 + $0x164] ss:$8 sps:$4 sm:$0xff]  }
   0x5   :  { %376 = vmatpush1.bf16.msra.mxu1 %v719_v10  ;;  %v725_v13 = vld [vmem:[%s1022_s1 + $0x160] ss:$8 sps:$4 sm:$0xff]   ;;  %v707_v14 = vld [vmem:[%s1022_s1 + $0x30] ss:$8 sps:$4 sm:$0xff]   ;;  %v708_v15 = vld [vmem:[%s1022_s1 + $0x24] ss:$8 sps:$4 sm:$0xff]  }
   0x6   :  { %377 = vmatprep.subr.bf16.mxu1 %v722_v12  ;;  %v728_v16 = vld [vmem:[%s1022_s1 + $0x154] ss:$8 sps:$4 sm:$0xff]   ;;  %v731_v17 = vld [vmem:[%s1022_s1 + $0x150] ss:$8 sps:$4 sm:$0xff]   ;;  %v710_v18 = vld [vmem:[%s1022_s1 + $0x20] ss:$8 sps:$4 sm:$0xff]  }
   0x7   :  { %337 = vmatpush1.bf16.msra.mxu0 %v698_v4  ;;  %v734_v19 = vld [vmem:[%s1022_s1 + $0x144] ss:$8 sps:$4 sm:$0xff]   ;;  %v711_v20 = vld [vmem:[%s1022_s1 + $0x14] ss:$8 sps:$4 sm:$0xff]   ;;  %v713_v21 = vld [vmem:[%s1022_s1 + $0x10] ss:$8 sps:$4 sm:$0xff]  }
   0x8   :  { %338 = vmatprep.subr.bf16.mxu0 %v699_v5  ;;  %v737_v22 = vld [vmem:[%s1022_s1 + $0x140] ss:$8 sps:$4 sm:$0xff]   ;;  %v740_v23 = vld [vmem:[%s1022_s1 + $0x134] ss:$8 sps:$4 sm:$0xff]   ;;  %v714_v24 = vld [vmem:[%s1022_s1 + $0x4] ss:$8 sps:$4 sm:$0xff]  }
   0x9   :  { %378 = vmatpush1.bf16.msra.mxu1 %v725_v13  ;;  %v743_v25 = vld [vmem:[%s1022_s1 + $0x130] ss:$8 sps:$4 sm:$0xff]   ;;  %v718_v26 = vld [vmem:[%s1022_s1] ss:$8 sps:$4 sm:$0xff]   ;;  %v746_v27 = vld [vmem:[%s1022_s1 + $0x124] ss:$8 sps:$4 sm:$0xff]  }
   0xa   :  { %379 = vmatprep.subr.bf16.mxu1 %v728_v16  ;;  %v720_v28 = vld [vmem:[%s1022_s1 + $0xf4] ss:$8 sps:$4 sm:$0xff]   ;;  %v724_v29 = vld [vmem:[%s1022_s1 + $0xf0] ss:$8 sps:$4 sm:$0xff]   ;;  %v749_v30 = vld [vmem:[%s1022_s1 + $0x120] ss:$8 sps:$4 sm:$0xff]  }
   0xb   :  { %339 = vmatpush1.bf16.msra.mxu0 %v701_v6  ;;  %v752_v31 = vld [vmem:[%s1022_s1 + $0x114] ss:$8 sps:$4 sm:$0xff]   ;;  %v726_v32 = vld [vmem:[%s1022_s1 + $0xe4] ss:$8 sps:$4 sm:$0xff]   ;;  %v730_v34 = vld [vmem:[%s1022_s1 + $0xe0] ss:$8 sps:$4 sm:$0xff]  }
   0xc   :  { %340 = vmatprep.subr.bf16.mxu0 %v702_v7  ;;  %v21_v33 = vld [vmem:[%s1023_s0] sm:$0xff]  ;;  %v755_v36 = vld [vmem:[%s1022_s1 + $0x110] ss:$8 sps:$4 sm:$0xff]   ;;  %v732_v38 = vld [vmem:[%s1022_s1 + $0xd4] ss:$8 sps:$4 sm:$0xff]  }
   0xd   :  { %380 = vmatpush1.bf16.msra.mxu1 %v731_v17  ;;  %v603_v35 = vcombine.high %v21_v33, %v21_v33  ;;  %v758_v37 = vld [vmem:[%s1022_s1 + $0x104] ss:$8 sps:$4 sm:$0xff]   ;;  %v736_v39 = vld [vmem:[%s1022_s1 + $0xd0] ss:$8 sps:$4 sm:$0xff]   ;;  %v761_v41 = vld [vmem:[%s1022_s1 + $0x100] ss:$8 sps:$4 sm:$0xff]   ;;  %v602_v60 = vcombine.low %v21_v33, %v21_v33 }
   0xe   :  { %381 = vmatprep.subr.bf16.mxu1 %v734_v19  ;;  %v738_v40 = vld [vmem:[%s1022_s1 + $0xc4] ss:$8 sps:$4 sm:$0xff]   ;;  %v764_v42 = vld [vmem:[%s1023_s0 + $0x8] ss:$0 sps:$4 sm:$0xff]   ;;  %v768_v43 = vld [vmem:[%s1024_s3 + $0x78] sm:$0xff]  }
   0xf   :  { %341 = vmatpush1.bf16.msra.mxu0 %v704_v8  ;;  %366 = vmatprep.mubr.bf16.mxu0 %v603_v35  ;;  %v769_v44 = vld [vmem:[%s1024_s3 + $0x38] sm:$0xff]   ;;  %v742_v45 = vld [vmem:[%s1022_s1 + $0xc0] ss:$8 sps:$4 sm:$0xff]   ;;  %v770_v46 = vld [vmem:[%s1024_s3 + $0x70] sm:$0xff]   ;;  %v73_v8 = vlaneseq }
  0x10   :  { %342 = vmatprep.subr.bf16.mxu0 %v705_v11  ;;  %v744_v47 = vld [vmem:[%s1022_s1 + $0xb4] ss:$8 sps:$4 sm:$0xff]   ;;  %v748_v49 = vld [vmem:[%s1022_s1 + $0xb0] ss:$8 sps:$4 sm:$0xff]   ;;  %v772_v50 = vld [vmem:[%s1024_s3 + $0x68] sm:$0xff]  }
  0x11   :  { %382 = vmatpush1.bf16.msra.mxu1 %v737_v22  ;;  %v771_v48 = vld [vmem:[%s1024_s3 + $0x30] sm:$0xff]   ;;  %v750_v51 = vld [vmem:[%s1022_s1 + $0xa4] ss:$8 sps:$4 sm:$0xff]   ;;  %v754_v53 = vld [vmem:[%s1022_s1 + $0xa0] ss:$8 sps:$4 sm:$0xff]   ;;  %v74_v10 = vshrl.u32 %v73_v8, 7 }
  0x12   :  { %383 = vmatprep.subr.bf16.mxu1 %v740_v23  ;;  %v773_v52 = vld [vmem:[%s1024_s3 + $0x28] sm:$0xff]   ;;  %v774_v54 = vld [vmem:[%s1024_s3 + $0x60] sm:$0xff]   ;;  %v756_v55 = vld [vmem:[%s1022_s1 + $0x94] ss:$8 sps:$4 sm:$0xff]  }
  0x13   :  { %343 = vmatpush1.bf16.msra.mxu0 %v707_v14  ;;  %v775_v56 = vld [vmem:[%s1024_s3 + $0x20] sm:$0xff]   ;;  %v760_v57 = vld [vmem:[%s1022_s1 + $0x90] ss:$8 sps:$4 sm:$0xff]   ;;  %v780_v1 = vld [vmem:[%s1024_s3 + $0x48] sm:$0xff]   ;;  %v75_v11 = vsub.s32 0, %v74_v10  ;;  %v79_v13 = vsub.s32 1, %v74_v10 }
  0x14   :  { %344 = vmatprep.subr.bf16.mxu0 %v708_v15  ;;  %v762_v58 = vld [vmem:[%s1022_s1 + $0x84] ss:$8 sps:$4 sm:$0xff]   ;;  %v765_v59 = vld [vmem:[%s1022_s1 + $0x80] ss:$8 sps:$4 sm:$0xff]   ;;  %v776_v61 = vld [vmem:[%s1024_s3 + $0x58] sm:$0xff]  }
  0x15   :  { %384 = vmatpush1.bf16.msra.mxu1 %v743_v25  ;;  %v777_v62 = vld [vmem:[%s1024_s3 + $0x18] sm:$0xff]   ;;  %v778_v63 = vld [vmem:[%s1024_s3 + $0x50] sm:$0xff]   ;;  %v781_v2 = vld [vmem:[%s1024_s3 + $0x8] sm:$0xff]  }
  0x16   :  { %385 = vmatprep.subr.bf16.mxu1 %v746_v27  ;;  %v779_v0 = vld [vmem:[%s1024_s3 + $0x10] sm:$0xff]   ;;  %v782_v3 = vld [vmem:[%s1024_s3 + $0x40] sm:$0xff]  }
  0x17   :  { %345 = vmatpush1.bf16.msra.mxu0 %v710_v18  ;;  %v783_v4 = vld [vmem:[%s1024_s3] sm:$0xff]  }
  0x18   :  { %346 = vmatprep.subr.bf16.mxu0 %v711_v20  ;;  %v71_v12 = vld [vmem:[%s1025_s2] sm:$0x3] }
  0x19   :  { %386 = vmatpush1.bf16.msra.mxu1 %v749_v30  ;;  %v76_v14 = vrot.slane %v71_v12, %v75_v11  ;;  %v80_v15 = vrot.slane %v71_v12, %v79_v13 }
  0x1a   :  { %387 = vmatprep.subr.bf16.mxu1 %v752_v31 }
  0x1b   :  { %347 = vmatpush1.bf16.msra.mxu0 %v713_v21 }
  0x1c   :  { %348 = vmatprep.subr.bf16.mxu0 %v714_v24 }
  0x1d   :  { %388 = vmatpush1.bf16.msra.mxu1 %v755_v36 }
  0x1e   :  { %389 = vmatprep.subr.bf16.mxu1 %v758_v37 }
  0x1f   :  { %349 = vmatpush1.bf16.msra.mxu0 %v718_v26 }
  0x20   :  { %350 = vmatprep.subr.bf16.mxu0 %v720_v28 }
  0x21   :  { %390 = vmatpush1.bf16.msra.mxu1 %v761_v41 }
  0x22   :  { %670 = vmatprep.subr.bf16.mxu1 %v768_v43 }
  0x23   :  { %351 = vmatpush2.bf16.msra.mxu0 %v724_v29  ;;  %v653_v29 = vld [vmem:[%s1026_s4] ss:$0 sm:$0xff] }
  0x24   :  { %352 = vmatprep.subr.bf16.mxu0 %v726_v32  ;;  %408 = vmatmul.mubr.bf16.vlgmr.msra.gmra.mxu1 %v764_v42 }
  0x25   :  { %671 = vmatpush3.bf16.msra.mxu1 %v769_v44 }
  0x26   :  { %672 = vmatprep.subr.bf16.mxu1 %v770_v46 }
  0x27   :  { %353 = vmatpush2.bf16.msra.mxu0 %v730_v34 }
  0x28   :  { %354 = vmatprep.subr.bf16.mxu0 %v732_v38 }
  0x29   :  { %673 = vmatpush3.bf16.msra.mxu1 %v771_v48 }
  0x2a   :  { %674 = vmatprep.subr.bf16.mxu1 %v772_v50 }
  0x2b   :  { %355 = vmatpush2.bf16.msra.mxu0 %v736_v39 }
  0x2c   :  { %356 = vmatprep.subr.bf16.mxu0 %v738_v40 }
  0x2d   :  { %675 = vmatpush3.bf16.msra.mxu1 %v773_v52 }
  0x2e   :  { %676 = vmatprep.subr.bf16.mxu1 %v774_v54 }
  0x2f   :  { %357 = vmatpush2.bf16.msra.mxu0 %v742_v45 }
  0x30   :  { %358 = vmatprep.subr.bf16.mxu0 %v744_v47 }
  0x31   :  { %677 = vmatpush3.bf16.msra.mxu1 %v775_v56 }
  0x32   :  { %678 = vmatprep.subr.bf16.mxu1 %v776_v61 }
  0x33   :  { %359 = vmatpush2.bf16.msra.mxu0 %v748_v49 }
  0x34   :  { %360 = vmatprep.subr.bf16.mxu0 %v750_v51 }
  0x35   :  { %679 = vmatpush3.bf16.msra.mxu1 %v777_v62 }
  0x36   :  { %680 = vmatprep.subr.bf16.mxu1 %v778_v63 }
  0x37   :  { %361 = vmatpush2.bf16.msra.mxu0 %v754_v53 }
  0x38   :  { %362 = vmatprep.subr.bf16.mxu0 %v756_v55 }
  0x39   :  { %681 = vmatpush3.bf16.msra.mxu1 %v779_v0 }
  0x3a   :  { %682 = vmatprep.subr.bf16.mxu1 %v780_v1 }
  0x3b   :  { %363 = vmatpush2.bf16.msra.mxu0 %v760_v57 }
  0x3c   :  { %364 = vmatprep.subr.bf16.mxu0 %v762_v58 }
  0x3d   :  { %683 = vmatpush3.bf16.msra.mxu1 %v781_v2 }
  0x3e   :  { %684 = vmatprep.subr.bf16.mxu1 %v782_v3 }
  0x3f   :  { %365 = vmatpush2.bf16.msra.mxu0 %v765_v59 }
  0x41   :  { %685 = vmatpush3.bf16.msra.mxu1 %v783_v4 }
  0x42   :  { %367 = vmatmul.mubr.bf16.vlgmr.msra.gmra.mxu0 %v602_v60 }
  0xe4   :  { %v409_v5 = vpop.f32.mrf.mxu1 }
  0xe6   :  { %v411_v6 = vpop.f32.mrf.mxu1 }
  0xe8   :  { %v413_v7 = vpop.f32.mrf.mxu1 }
  0xea   :  { %v414_v9 = vpop.f32.mrf.mxu1 }
 0x102   :  { %v368_v16 = vpop.f32.mrf.mxu0 }
 0x103   :  { %v369_v17 = vadd.f32 %v368_v16, %v76_v14 }
 0x104   :  { %v370_v18 = vpop.f32.mrf.mxu0 }
 0x105   :  { %v410_v19 = vadd.f32 %v409_v5, %v369_v17  ;;  %v371_v20 = vadd.f32 %v370_v18, %v80_v15 }
 0x106   :  { %v372_v21 = vpop.f32.mrf.mxu0 }
 0x107   :  { %v412_v22 = vadd.f32 %v411_v6, %v371_v20  ;;  %v416_v23 = vmax.f32 %v410_v19, 0.0 }
 0x108   :  { %v373_v24 = vpop.f32.mrf.mxu0 }
 0x109   :  { %v417_v25 = vmax.f32 %v412_v22, 0.0  ;;  %v418_v27 = vpack.c.bf16 %v416_v23, %v416_v23 }
 0x10b   :  { %v419_v26 = vpack.c.bf16 %v417_v25, %v417_v25 }
 0x10d   :  { %587 = vmatprep.mubr.bf16.mxu1 %v419_v26 }
 0x10e   :  { %588 = vmatmul.mubr.bf16.vlgmr.msra.gmra.mxu1 %v418_v27 }
 0x1ce   :  { %v686_v28 = vpop.f32.mrf.mxu1 }
 0x1d0   :  { %v687_v30 = vpop.f32.mrf.mxu1 }
 0x1d1   :  { %v688_v31 = vadd.f32 %v687_v30, %v686_v28 }
 0x1d2   :  { %v689_v32 = vpop.f32.mrf.mxu1 }
 0x1d3   :  { %v590_v33 = vadd.f32 %v688_v31, %v653_v29 }
 0x1d4   :  { %v690_v34 = vpop.f32.mrf.mxu1 }
 0x1d5   :  { %v595_v35 = vmax.f32 %v590_v33, 0.0 }
 0x1d7   :  { %597 = vst.msk [vmem:[%s1027_s5] sm:$0xff] %vm596_vm0, %v595_v35 }

</bundles_post_ra>
